<compile_context>
chip_gen: v7x
topology: tpu7x:2x2x1
jax: 0.10.0
libtpu: 0.0.40
codegen_flags: <defaults>
</compile_context>

<pallas_src>
import functools

import jax
import jax.numpy as jnp
import numpy as np
from jax import lax
from jax.experimental import pallas as pl
from jax.experimental.pallas import tpu as pltpu


def _round_up(x, m):
    return -(-x // m) * m


# ----------------------------------------------------------------------------
# roll-direction probe (defensive: pin the rotate convention once per backend)
# ----------------------------------------------------------------------------
@functools.lru_cache(maxsize=None)
def _roll_sign_for_backend(backend):
    """Return s such that pltpu.roll(x, (s*shift) % n, axis)[f] == x[f+shift]."""
    del backend  # cache key only

    def probe(x_ref, o_ref):
        o_ref[...] = pltpu.roll(x_ref[...], 1, 1)

    with jax.ensure_compile_time_eval():
        x = lax.broadcasted_iota(jnp.int32, (8, 128), 1)
        y = pl.pallas_call(
            probe, out_shape=jax.ShapeDtypeStruct((8, 128), jnp.int32))(x)
        jnp_convention = int(y[0, 1]) == 0        # y[i] = x[i-1]  (np.roll)
    return -1 if jnp_convention else 1


def _roll_sign():
    return _roll_sign_for_backend(jax.default_backend())


# ----------------------------------------------------------------------------
# Fused kernel: conv1+ReLU+GN -> conv2+ReLU+GN -> conv1x1 + residual
# (the MaxPool3d already happened in the wrapper; its result is the input)
# ----------------------------------------------------------------------------
def _down_block_kernel(pooled_ref, w1_ref, w2_ref, w3_ref, aff_ref, o_ref,
                       cols_ref, *, c_out, cp1, cp2, dp, hp, wp, eps,
                       roll_sign):
    vox = dp * hp * wp
    pooled = pooled_ref[0]                          # (C, Vox), lane-dense

    # ---- 27 combined boundary masks, built once, reused by both convs ------
    f_idx = lax.broadcasted_iota(jnp.int32, (1, vox), 1)
    d_idx = f_idx // (hp * wp)
    h_idx = (f_idx // wp) % hp
    w_idx = f_idx % wp
    d_ok = [d_idx >= 1, None, d_idx < dp - 1]       # tap index 0, 1, 2
    h_ok = [h_idx >= 1, None, h_idx < hp - 1]
    w_ok = [w_idx >= 1, None, w_idx < wp - 1]
    masks = []                                      # tap -> (1, Vox) bool | None
    for kd in range(3):
        for kh in range(3):
            for kw in range(3):
                m = None
                for part in (d_ok[kd], h_ok[kh], w_ok[kw]):
                    if part is not None:
                        m = part if m is None else jnp.logical_and(m, part)
                masks.append(m)

    def pad_rows(a, rows):
        extra = rows - a.shape[0]
        if extra == 0:
            return a
        return jnp.concatenate(
            [a, jnp.zeros((extra, a.shape[1]), a.dtype)], axis=0)

    def conv3_relu_gn(act, w_ref, cin_pad, b_col, g_col, bt_col):
        # act: (cin_pad, Vox); rows >= true Cin are zero (their weight columns
        # are zero too).  Conv = 3 partial MXU dots, one per kd plane, each a
        # (Cout, 9*cin_pad) @ (9*cin_pad, Vox) product on an im2col plane
        # built in VMEM (lane rolls + hoisted boundary masks).
        acc = None
        for kd in range(3):
            for kh in range(3):
                for kw in range(3):
                    t = kh * 3 + kw                         # tap within plane
                    tap = (kd * 3 + kh) * 3 + kw
                    shift = (kd - 1) * hp * wp + (kh - 1) * wp + (kw - 1)
                    col = act
                    if shift != 0:
                        col = pltpu.roll(col, (roll_sign * shift) % vox, 1)
                    if masks[tap] is not None:
                        col = jnp.where(masks[tap], col, 0.0)
                    cols_ref[t * cin_pad:(t + 1) * cin_pad, :] = col
            part = jnp.dot(w_ref[kd], cols_ref[0:9 * cin_pad, :],
                           preferred_element_type=jnp.float32)
            acc = part if acc is None else acc + part
        y = jnp.maximum(acc + b_col, 0.0)           # bias + ReLU
        # Fused GroupNorm(num_groups=1): single-pass sum & sum-of-squares in
        # f32, folded into per-channel scale/shift -> one y*scale+shift pass.
        denom = jnp.float32(c_out * vox)
        mean = jnp.sum(y) / denom
        var = jnp.sum(y * y) / denom - mean * mean
        scale = g_col * lax.rsqrt(var + eps)        # (Cout, 1)
        shift_ = bt_col - mean * scale
        return y * scale + shift_

    out2 = conv3_relu_gn(pad_rows(pooled, cp1), w1_ref, cp1,
                         aff_ref[:, 0:1], aff_ref[:, 1:2], aff_ref[:, 2:3])
    out3 = conv3_relu_gn(pad_rows(out2, cp2), w2_ref, cp2,
                         aff_ref[:, 3:4], aff_ref[:, 4:5], aff_ref[:, 5:6])

    # ---- 1x1 conv (2C -> C, no bias) + residual with the pooled input ------
    # TODO(synk): operands kept f32 (default MXU precision) to stay inside the
    # 1e-4 check; switch to explicit bf16 casts once the tolerance is relaxed.
    o_ref[0] = jnp.dot(w3_ref[...], out3,
                       preferred_element_type=jnp.float32) + pooled


# ----------------------------------------------------------------------------
# Wrapper (pooling + pure layout glue outside the kernel)
# ----------------------------------------------------------------------------
def down_block_small_forward(x, params):
    """x: (N, C, D, H, W) float32 (PyTorch NCDHW). Returns (N, C, D/2, H/2, W/2)."""
    n, c, d, h, w = x.shape
    dp, hp, wp = d // 2, h // 2, w // 2
    vox = dp * hp * wp
    c2 = 2 * c
    cp1 = _round_up(c, 8)       # conv1 input-channel granule (exact if C%8==0)
    cp2 = _round_up(c2, 8)      # conv2 input-channel granule
    w1, b1, g1, bt1, w2, b2, g2, bt2, w1x1 = params

    # MaxPool3d(2) in XLA: the kernel only ever sees the pooled volume (|x|/8).
    pooled = (x.reshape(n, c, dp, 2, hp, 2, wp, 2)
               .max(axis=(3, 5, 7))
               .reshape(n, c, vox))

    # Conv weights per kd plane, flattened to (3, Cout, 9*Cin'); column index
    # within a plane = (kh*3+kw)*Cin' + ci, Cin' padded to the 8-sublane
    # granule so the in-kernel im2col stores stay sublane-aligned.
    w1_t = jnp.transpose(w1, (2, 0, 3, 4, 1))                   # (3, 2C, 3, 3, C)
    w1_f = jnp.pad(w1_t, ((0, 0),) * 4 + ((0, cp1 - c),)).reshape(3, c2, 9 * cp1)
    w2_t = jnp.transpose(w2, (2, 0, 3, 4, 1))                   # (3, 2C, 3, 3, 2C)
    w2_f = jnp.pad(w2_t, ((0, 0),) * 4 + ((0, cp2 - c2),)).reshape(3, c2, 9 * cp2)
    w3_f = w1x1[:, :, 0, 0, 0]                                  # (C, 2C)
    aff = jnp.stack([b1, g1, bt1, b2, g2, bt2], axis=1)         # (2C, 6)

    kernel = functools.partial(
        _down_block_kernel, c_out=c2, cp1=cp1, cp2=cp2,
        dp=dp, hp=hp, wp=wp, eps=1e-5, roll_sign=_roll_sign())

    # Explicit VMEM budget (v5e default scoped limit is only 16 MiB).
    f32b = 4
    weight_bytes = (w1_f.size + w2_f.size + w3_f.size + aff.size) * f32b
    block_bytes = (4 * c * vox * f32b            # pooled + out blocks, 2x buffered
                   + 2 * weight_bytes            # weights, 2x buffered
                   + 9 * cp2 * vox * f32b        # im2col scratch
                   + 6 * c2 * vox * f32b)        # live activations headroom
    vmem_limit = int(min(100 * 2 ** 20, max(32 * 2 ** 20, 2 * block_bytes)))

    out = pl.pallas_call(
        kernel,
        out_shape=jax.ShapeDtypeStruct((n, c, vox), jnp.float32),
        grid=(n,),
        in_specs=[
            pl.BlockSpec((1, c, vox), lambda i: (i, 0, 0)),
            pl.BlockSpec((3, c2, 9 * cp1), lambda i: (0, 0, 0)),
            pl.BlockSpec((3, c2, 9 * cp2), lambda i: (0, 0, 0)),
            pl.BlockSpec((c, c2), lambda i: (0, 0)),
            pl.BlockSpec((c2, 6), lambda i: (0, 0)),
        ],
        out_specs=pl.BlockSpec((1, c, vox), lambda i: (i, 0, 0)),
        scratch_shapes=[pltpu.VMEM((9 * cp2, vox), jnp.float32)],
        compiler_params=pltpu.CompilerParams(
            dimension_semantics=("parallel",),
            vmem_limit_bytes=vmem_limit),
    )(pooled, w1_f, w2_f, w3_f, aff)

    # (N, C, Vox) is already NCDHW order; just restore the spatial dims.
    return out.reshape(n, c, dp, hp, wp)


# ----------------------------------------------------------------------------
# Pure-JAX reference (for correctness check)
# ----------------------------------------------------------------------------
def down_block_small_reference(x, params):
    w1, b1, g1, bt1, w2, b2, g2, bt2, w1x1 = params
    n, c, d, h, w = x.shape
    pooled = x.reshape(n, c, d // 2, 2, h // 2, 2, w // 2, 2).max(axis=(3, 5, 7))
    dn = ("NCDHW", "OIDHW", "NCDHW")

    def conv3(y, wt, b):
        out = lax.conv_general_dilated(y, wt, (1, 1, 1),
                                       [(1, 1), (1, 1), (1, 1)],
                                       dimension_numbers=dn)
        return out + b[None, :, None, None, None]

    def gn(y, g, bt, eps=1e-5):
        mu = y.mean(axis=(1, 2, 3, 4), keepdims=True)
        var = ((y - mu) ** 2).mean(axis=(1, 2, 3, 4), keepdims=True)
        return (y - mu) / jnp.sqrt(var + eps) * g[None, :, None, None, None] \
            + bt[None, :, None, None, None]

    o2 = gn(jnp.maximum(conv3(pooled, w1, b1), 0.0), g1, bt1)
    o3 = gn(jnp.maximum(conv3(o2, w2, b2), 0.0), g2, bt2)
    o4 = lax.conv_general_dilated(o3, w1x1, (1, 1, 1), "VALID",
                                  dimension_numbers=dn)
    return o4 + pooled


# ----------------------------------------------------------------------------
# Main
# ----------------------------------------------------------------------------
if __name__ == "__main__":
    _roll_sign()   # run the tiny direction probe once, outside jit

    key = jax.random.PRNGKey(0)
    N, C, D, H, W = 2, 4, 16, 16, 16
    C2 = 2 * C

    ks = jax.random.split(key, 8)
    x = jax.random.normal(ks[0], (N, C, D, H, W), jnp.float32)

    # Deterministic synthetic parameters (PyTorch shapes: OIDHW conv weights).
    w1 = 0.1 * jax.random.normal(ks[1], (C2, C, 3, 3, 3), jnp.float32)
    b1 = 0.1 * jax.random.normal(ks[2], (C2,), jnp.float32)
    g1 = jnp.ones((C2,), jnp.float32)
    bt1 = jnp.zeros((C2,), jnp.float32)
    w2 = 0.1 * jax.random.normal(ks[3], (C2, C2, 3, 3, 3), jnp.float32)
    b2 = 0.1 * jax.random.normal(ks[4], (C2,), jnp.float32)
    g2 = 1.0 + 0.05 * jax.random.normal(ks[5], (C2,), jnp.float32)
    bt2 = 0.05 * jax.random.normal(ks[6], (C2,), jnp.float32)
    w1x1 = 0.1 * jax.random.normal(ks[7], (C, C2, 1, 1, 1), jnp.float32)

    params = (w1, b1, g1, bt1, w2, b2, g2, bt2, w1x1)

    out = jax.jit(down_block_small_forward)(x, params)
    out = jax.block_until_ready(out)

    ref = jax.block_until_ready(down_block_small_reference(x, params))

    assert out.shape == (N, C, D // 2, H // 2, W // 2), out.shape
    np.testing.assert_allclose(np.asarray(out), np.asarray(ref),
                               rtol=1e-4, atol=1e-4)
    print("KERNEL_OK")
</pallas_src>

<mosaic_0001>
module attributes {stable_mosaic.version = 11 : i64} {
  func.func @probe(%arg0: memref<8x128xi32, #tpu.memory_space<vmem>>, %arg1: memref<8x128xi32, #tpu.memory_space<vmem>>) attributes {dimension_semantics = [], scalar_prefetch = 0 : i64, scratch_operands = 0 : i64, tpu.core_type = #tpu.core_type<tc>} {
    %c0 = arith.constant 0 : index
    %c0_0 = arith.constant 0 : index
    %0 = vector.load %arg0[%c0, %c0_0] : memref<8x128xi32, #tpu.memory_space<vmem>>, vector<8x128xi32>
    %c1_i32 = arith.constant 1 : i32
    %1 = tpu.dynamic_rotate %0 by %c1_i32 dim 1 : vector<8x128xi32>, i32 -> vector<8x128xi32>
    %c0_1 = arith.constant 0 : index
    %c0_2 = arith.constant 0 : index
    %2 = vector.load %arg1[%c0_1, %c0_2] : memref<8x128xi32, #tpu.memory_space<vmem>>, vector<8x128xi32>
    tpu.vector_store %arg1[%c0_1, %c0_2], %1 {strides = array<i32>} : memref<8x128xi32, #tpu.memory_space<vmem>>, vector<8x128xi32>,
    return
  }
}

</mosaic_0001>

<bundles_post_ra>
// kernel: tpu_custom_call.1
= control target key start
LH: loop header
LB: loop body
LE: loop exit
PB: predicated region body
PF: predicated region fallthrough
CT: control target
= control target key end

     0   :  { %6 = vsyncpa [#allocation3], 0  ;;  %s128_s0 = inlined_call_operand.hbm [shape: s32[8,128], index: 0, kind: input, shape index: {}]   ;;  %s129_s1 = inlined_call_operand.hbm [shape: s32[8,128], index: 1, kind: output, shape index: {}]  }
   0x1   :  { %7 = vsyncpa [#allocation4], 0  ;;  %s91_s6 = smov [#allocation2]   ;;  %s43_s10 = scalar_lea.hbm %s128_s0, 128 }
   0x2   :  { %s14_s7 = sshll.u32 %s91_s6, 4  ;;  %p44_p0 = scmp.ne.s32.totalorder %s128_s0, %s43_s10  ;;  %s15_s7 = int_to_ptr.vmem [resolvable:$true] %s14_s7 }
   0x3   :  { %p47_p1 = scmp.lt.u32.totalorder %s43_s10, %s128_s0 }
   0x5   :  { %p49_p2 = pnand %p47_p1, %p44_p0 }
   0x7   :  { %52 = shalt.err (!%p49_p2)
}
   0x8   :  { %s53_s15 = scalar_lea.vmem %s15_s7, 128  ;;  %p58_p4 = scmp.lt.s32.totalorder %s15_s7, %s15_s7 }
   0x9   :  { %p54_p3 = scmp.ne.s32.totalorder %s15_s7, %s53_s15  ;;  %p59_p5 = scmp.lt.s32.totalorder %s53_s15, %s53_s15 }
   0xb   :  { %p60_p6 = por %p59_p5, %p58_p4 }
   0xd   :  { %p61_p7 = pnand %p60_p6, %p54_p3 }
   0xf   :  { %64 = shalt.err (!%p61_p7)
}
  0x10   :  { %17 = dma.hbm_to_vmem [thread:$0]  %s128_s0, 128, %s15_s7, [#allocation3]  }
  0x11   :  { %87 = dma.done.wait [#allocation3], 128  }
  0x12   :  { %88 = vsyncadd [#allocation3], 4294967168  ;;  %v21_v0 = vld [vmem:[#allocation2] sm:$0xff]  ;;  %s92_s18 = smov 1   ;;  %s93_s19 = smov [#allocation5]  }
  0x13   :  { %22 = vrot.lane.b32.xlu0 %v21_v0, %s92_s18  ;;  %s31_s20 = sshll.u32 %s93_s19, 4  ;;  %s32_s20 = int_to_ptr.vmem [resolvable:$true] %s31_s20 }
  0x14   :  { %s65_s21 = scalar_lea.vmem %s32_s20, 128  ;;  %p70_p9 = scmp.lt.s32.totalorder %s32_s20, %s32_s20 }
  0x15   :  { %p66_p8 = scmp.ne.s32.totalorder %s32_s20, %s65_s21  ;;  %p71_p10 = scmp.lt.s32.totalorder %s65_s21, %s65_s21 }
  0x17   :  { %p72_p11 = por %p71_p10, %p70_p9 }
  0x19   :  { %p73_p12 = pnand %p72_p11, %p66_p8 }
  0x85   :  { %v23_v1 = vpop.permute.xlu0 %22 }
  0x86   :  { %24 = vst [vmem:[#allocation5] sm:$0xff] %v23_v1 }
  0x87   :  { %76 = shalt.err (!%p73_p12)
}
  0x88   :  { %s77_s0 = scalar_lea.hbm %s129_s1, 128 }
  0x89   :  { %p78_p13 = scmp.ne.s32.totalorder %s129_s1, %s77_s0  ;;  %p81_p0 = scmp.lt.u32.totalorder %s77_s0, %s129_s1 }
  0x8b   :  { %p83_p1 = pnand %p81_p0, %p78_p13 }
  0x8d   :  { %86 = shalt.err (!%p83_p1)
}
  0x8e   :  { %34 = dma.vmem_to_hbm [thread:$0]  %s32_s20, 128, %s129_s1, [#allocation4]  }
  0x8f   :  { %89 = dma.done.wait [#allocation4], 128  }
  0x90   :  { %90 = vsyncadd [#allocation4], 4294967168 }
  0x91   :  { %38 = vsyncpa [#allocation3], 1 }
  0x92   :  { %39 = vsyncpa [#allocation4], 1 }

</bundles_post_ra>
